<compile_context>
chip_gen: v5e
topology: v5e:2x2
jax: 0.10.0
libtpu: 0.0.40
codegen_flags: <defaults>
</compile_context>

<pallas_src>
import jax
import jax.numpy as jnp
import numpy as np
from jax.experimental import pallas as pl
from jax.experimental.pallas import tpu as pltpu

EPS = 1e-8


# ----------------------------------------------------------------------------
# Pallas kernel
# ----------------------------------------------------------------------------
def _cln_kernel(y_ref, gamma_ref, beta_ref, out_ref):
    # Single explicit upcast of the streamed block; all math stays f32.
    y = y_ref[...].astype(jnp.float32)                # (Mb, N, Kb)
    inv_n = 1.0 / y.shape[1]

    # Fused single pass over the channel (sublane) axis for both statistics.
    s = jnp.sum(y, axis=1, keepdims=True)             # (Mb, 1, Kb)
    ss = jnp.sum(y * y, axis=1, keepdims=True)        # (Mb, 1, Kb)
    mean = s * inv_n
    var = ss * inv_n - mean * mean                    # biased (unbiased=False)
    var = jnp.maximum(var, 0.0)                       # guard f32 cancellation
    inv_std = jax.lax.rsqrt(var + EPS)                # EUP rsqrt, no divide

    gamma = gamma_ref[...]                            # (1, N, Kb) lane-dense f32
    beta = beta_ref[...]                              # (1, N, Kb) lane-dense f32
    out_ref[...] = ((y - mean) * inv_std * gamma + beta).astype(out_ref.dtype)


# ----------------------------------------------------------------------------
# VMEM limit / budget (generation-aware)
# ----------------------------------------------------------------------------
def _vmem_budget():
    try:
        info = pltpu.get_tpu_info()
        phys = int(getattr(info, "vmem_capacity_bytes", 0)) or 128 * 1024 * 1024
    except Exception:
        phys = 128 * 1024 * 1024
    # 3/4 of physical VMEM, capped: 48 MiB on v7x (64 MiB phys), 96 MiB on
    # v5e/v6e (128 MiB phys) -- leaves headroom for compiler scratch.
    limit = min((phys * 3) // 4, 96 * 1024 * 1024)
    budget = limit // 2       # tiling budget derived from the limit
    return int(limit), int(budget)


# ----------------------------------------------------------------------------
# Tiling heuristic (cdiv grids, lane-dense K tiles, >=2 parallel steps)
# ----------------------------------------------------------------------------
def _pick_tiles(M, N, K, itemsize, budget_bytes):
    cdiv = lambda a, b: -(-a // b)
    # Budget covers the double-buffered in + out activation stream (~4 blocks).
    max_block_elems = max(budget_bytes // (4 * itemsize), N * 128)

    # Time (lane) tile: full K if a single batch row fits, else a multiple of
    # 128 (edge block padded via the cdiv grid).
    if K <= 128 or N * K <= max_block_elems:
        kb = K
    else:
        kb = max(128, ((max_block_elems // N) // 128) * 128)

    # Batch tile: as many rows as fit the budget.
    mb = int(max(1, min(M, max_block_elems // (N * kb))))

    # Guarantee >=2 grid steps along a parallel axis (v7x megacore).
    if cdiv(M, mb) * cdiv(K, kb) < 2:
        if M >= 2:
            mb = cdiv(M, 2)
        elif K > 128:
            kb = max(128, cdiv(cdiv(K, 2), 128) * 128)

    # Trim mb until activations (4x) + resident param slabs (2 params x ~2 buf)
    # fit the budget.
    def _bytes(mb_, kb_):
        return 4 * mb_ * N * kb_ * itemsize + 4 * N * kb_ * 4
    while mb > 1 and _bytes(mb, kb) > budget_bytes:
        mb -= 1
    return mb, kb


# ----------------------------------------------------------------------------
# Wrapper
# ----------------------------------------------------------------------------
def channelwise_layer_norm(y, gamma, beta):
    """y: [M, N, K] (f32 or bf16); gamma/beta: (1, N, 1). Returns [M, N, K]."""
    M, N, K = y.shape
    out_dtype = y.dtype
    itemsize = jnp.dtype(out_dtype).itemsize

    vmem_limit, budget = _vmem_budget()
    mb, kb = _pick_tiles(M, N, K, itemsize, budget)
    grid = (pl.cdiv(M, mb), pl.cdiv(K, kb))

    # Lane-dense parameter slabs; constant block index -> stay resident.
    gamma_s = jnp.broadcast_to(
        gamma.reshape(1, N, 1).astype(jnp.float32), (1, N, kb))
    beta_s = jnp.broadcast_to(
        beta.reshape(1, N, 1).astype(jnp.float32), (1, N, kb))

    act_spec = pl.BlockSpec((mb, N, kb), lambda m, k: (m, 0, k))
    par_spec = pl.BlockSpec((1, N, kb), lambda m, k: (0, 0, 0))

    cost = pl.CostEstimate(
        flops=7 * M * N * K,
        transcendentals=M * K,
        bytes_accessed=2 * M * N * K * itemsize + 2 * 4 * N * kb,
    )

    return pl.pallas_call(
        _cln_kernel,
        out_shape=jax.ShapeDtypeStruct((M, N, K), out_dtype),
        grid=grid,
        in_specs=[act_spec, par_spec, par_spec],
        out_specs=act_spec,
        compiler_params=pltpu.CompilerParams(
            dimension_semantics=("parallel", "parallel"),
            vmem_limit_bytes=vmem_limit,
        ),
        cost_estimate=cost,
    )(y, gamma_s, beta_s)


# ----------------------------------------------------------------------------
# Pure-JAX reference (mirrors the PyTorch module exactly, in f32)
# ----------------------------------------------------------------------------
def channelwise_layer_norm_ref(y, gamma, beta):
    y = y.astype(jnp.float32)
    gamma = gamma.astype(jnp.float32)
    beta = beta.astype(jnp.float32)
    mean = jnp.mean(y, axis=1, keepdims=True)
    var = jnp.mean((y - mean) ** 2, axis=1, keepdims=True)   # unbiased=False
    return gamma * (y - mean) / jnp.sqrt(var + EPS) + beta


# ----------------------------------------------------------------------------
# Main
# ----------------------------------------------------------------------------
if __name__ == "__main__":
    key = jax.random.PRNGKey(0)
    k0, k1, k2, k3 = jax.random.split(key, 4)

    # --- Case 1: f32, evenly tiled shape -------------------------------------
    M, N, K = 4, 16, 256          # batch, channels, time
    y = jax.random.normal(k0, (M, N, K), jnp.float32)
    gamma = 1.0 + 0.1 * jax.random.normal(k1, (1, N, 1), jnp.float32)
    beta = 0.1 * jax.random.normal(k2, (1, N, 1), jnp.float32)

    out = channelwise_layer_norm(y, gamma, beta)
    jax.block_until_ready(out)
    ref = channelwise_layer_norm_ref(y, gamma, beta)
    np.testing.assert_allclose(np.asarray(out), np.asarray(ref),
                               rtol=1e-4, atol=1e-4)

    # --- Case 2: f32, shape that needs padded (cdiv) edge blocks -------------
    M2, N2, K2 = 3, 16, 200
    y2 = jax.random.normal(k3, (M2, N2, K2), jnp.float32)
    g2 = jnp.ones((1, N2, 1), jnp.float32)
    b2 = jnp.zeros((1, N2, 1), jnp.float32)
    out2 = channelwise_layer_norm(y2, g2, b2)
    jax.block_until_ready(out2)
    ref2 = channelwise_layer_norm_ref(y2, g2, b2)
    np.testing.assert_allclose(np.asarray(out2), np.asarray(ref2),
                               rtol=1e-4, atol=1e-4)

    # --- Case 3: bf16 activation I/O (f32 math inside the kernel) ------------
    y_bf16 = y.astype(jnp.bfloat16)
    out_bf16 = channelwise_layer_norm(y_bf16, gamma, beta)
    jax.block_until_ready(out_bf16)
    ref_bf16 = channelwise_layer_norm_ref(y_bf16, gamma, beta)
    np.testing.assert_allclose(np.asarray(out_bf16, dtype=np.float32),
                               np.asarray(ref_bf16), rtol=5e-2, atol=5e-2)

    print("KERNEL_OK")
</pallas_src>

<mosaic_0001>
module attributes {stable_mosaic.version = 11 : i64} {
  func.func @_cln_kernel(%arg0: i32, %arg1: i32, %arg2: memref<2x16x256xf32, #tpu.memory_space<vmem>>, %arg3: memref<1x16x256xf32, #tpu.memory_space<vmem>>, %arg4: memref<1x16x256xf32, #tpu.memory_space<vmem>>, %arg5: memref<2x16x256xf32, #tpu.memory_space<vmem>>) attributes {dimension_semantics = [#tpu.dimension_semantics<parallel>, #tpu.dimension_semantics<parallel>], iteration_bounds = array<i64: 2, 1>, scalar_prefetch = 0 : i64, scratch_operands = 0 : i64, tpu.core_type = #tpu.core_type<tc>, window_params = [{transform_indices = @transform_0, window_bounds = array<i64: 2, 16, 256>}, {pipeline_mode = #tpu.pipeline_mode<synchronous>, transform_indices = @transform_1, window_bounds = array<i64: 1, 16, 256>}, {pipeline_mode = #tpu.pipeline_mode<synchronous>, transform_indices = @transform_2, window_bounds = array<i64: 1, 16, 256>}, {transform_indices = @transform_3, window_bounds = array<i64: 2, 16, 256>}]} {
    %c0 = arith.constant 0 : index
    %c0_0 = arith.constant 0 : index
    %c0_1 = arith.constant 0 : index
    %0 = vector.load %arg2[%c0, %c0_0, %c0_1] : memref<2x16x256xf32, #tpu.memory_space<vmem>>, vector<2x16x256xf32>
    %cst = arith.constant dense<0.000000e+00> : vector<2x256xf32>
    %1 = vector.multi_reduction <add>, %0, %cst [1] : vector<2x16x256xf32> to vector<2x256xf32>
    %2 = vector.shape_cast %1 : vector<2x256xf32> to vector<2x1x256xf32>
    %3 = arith.mulf %0, %0 : vector<2x16x256xf32>
    %cst_2 = arith.constant dense<0.000000e+00> : vector<2x256xf32>
    %4 = vector.multi_reduction <add>, %3, %cst_2 [1] : vector<2x16x256xf32> to vector<2x256xf32>
    %5 = vector.shape_cast %4 : vector<2x256xf32> to vector<2x1x256xf32>
    %cst_3 = arith.constant 6.250000e-02 : f32
    %6 = vector.broadcast %cst_3 : f32 to vector<2x1x256xf32>
    %7 = arith.mulf %2, %6 : vector<2x1x256xf32>
    %cst_4 = arith.constant 6.250000e-02 : f32
    %8 = vector.broadcast %cst_4 : f32 to vector<2x1x256xf32>
    %9 = arith.mulf %5, %8 : vector<2x1x256xf32>
    %10 = arith.mulf %7, %7 : vector<2x1x256xf32>
    %11 = arith.subf %9, %10 : vector<2x1x256xf32>
    %cst_5 = arith.constant 0.000000e+00 : f32
    %12 = vector.broadcast %cst_5 : f32 to vector<2x1x256xf32>
    %13 = arith.maximumf %11, %12 : vector<2x1x256xf32>
    %cst_6 = arith.constant 9.99999993E-9 : f32
    %14 = vector.broadcast %cst_6 : f32 to vector<2x1x256xf32>
    %15 = arith.addf %13, %14 : vector<2x1x256xf32>
    %16 = math.rsqrt %15 : vector<2x1x256xf32>
    %c0_7 = arith.constant 0 : index
    %c0_8 = arith.constant 0 : index
    %c0_9 = arith.constant 0 : index
    %17 = vector.load %arg3[%c0_7, %c0_8, %c0_9] : memref<1x16x256xf32, #tpu.memory_space<vmem>>, vector<1x16x256xf32>
    %c0_10 = arith.constant 0 : index
    %c0_11 = arith.constant 0 : index
    %c0_12 = arith.constant 0 : index
    %18 = vector.load %arg4[%c0_10, %c0_11, %c0_12] : memref<1x16x256xf32, #tpu.memory_space<vmem>>, vector<1x16x256xf32>
    %19 = vector.broadcast %7 : vector<2x1x256xf32> to vector<2x16x256xf32>
    %20 = arith.subf %0, %19 : vector<2x16x256xf32>
    %21 = vector.broadcast %16 : vector<2x1x256xf32> to vector<2x16x256xf32>
    %22 = arith.mulf %20, %21 : vector<2x16x256xf32>
    %23 = vector.broadcast %17 : vector<1x16x256xf32> to vector<2x16x256xf32>
    %24 = arith.mulf %22, %23 : vector<2x16x256xf32>
    %25 = vector.broadcast %18 : vector<1x16x256xf32> to vector<2x16x256xf32>
    %26 = arith.addf %24, %25 : vector<2x16x256xf32>
    %c0_13 = arith.constant 0 : index
    %c0_14 = arith.constant 0 : index
    %c0_15 = arith.constant 0 : index
    %27 = vector.load %arg5[%c0_13, %c0_14, %c0_15] : memref<2x16x256xf32, #tpu.memory_space<vmem>>, vector<2x16x256xf32>
    tpu.vector_store %arg5[%c0_13, %c0_14, %c0_15], %26 {strides = array<i32>} : memref<2x16x256xf32, #tpu.memory_space<vmem>>, vector<2x16x256xf32>,
    return
  }
  func.func @transform_0(%arg0: i32, %arg1: i32) -> (i32, i32, i32) {
    %c0_i32 = arith.constant 0 : i32
    %c0_i32_0 = arith.constant 0 : i32
    return %arg0, %c0_i32, %arg1 : i32, i32, i32
  }
  func.func @transform_1(%arg0: i32, %arg1: i32) -> (i32, i32, i32) {
    %c0_i32 = arith.constant 0 : i32
    %c0_i32_0 = arith.constant 0 : i32
    %c0_i32_1 = arith.constant 0 : i32
    %c0_i32_2 = arith.constant 0 : i32
    return %c0_i32, %c0_i32_0, %c0_i32_1 : i32, i32, i32
  }
  func.func @transform_2(%arg0: i32, %arg1: i32) -> (i32, i32, i32) {
    %c0_i32 = arith.constant 0 : i32
    %c0_i32_0 = arith.constant 0 : i32
    %c0_i32_1 = arith.constant 0 : i32
    %c0_i32_2 = arith.constant 0 : i32
    return %c0_i32, %c0_i32_0, %c0_i32_1 : i32, i32, i32
  }
  func.func @transform_3(%arg0: i32, %arg1: i32) -> (i32, i32, i32) {
    %c0_i32 = arith.constant 0 : i32
    %c0_i32_0 = arith.constant 0 : i32
    return %arg0, %c0_i32, %arg1 : i32, i32, i32
  }
}

</mosaic_0001>

<bundles_post_ra>
// kernel: tpu_custom_call.1
= control target key start
LH: loop header
LB: loop body
LE: loop exit
PB: predicated region body
PF: predicated region fallthrough
CT: control target
= control target key end

     0   :  { %8 = vsyncpa [#allocation3], 0  ;;  %s1127_s0 = inlined_call_operand.hbm [shape: f32[4,16,256], index: 0, kind: input, shape index: {}]   ;;  %s1128_s1 = inlined_call_operand.hbm [shape: f32[1,16,256], index: 1, kind: input, shape index: {}]   ;;  %s1129_s2 = inlined_call_operand.hbm [shape: f32[1,16,256], index: 2, kind: input, shape index: {}]   ;;  %s1130_s3 = inlined_call_operand.hbm [shape: f32[4,16,256], index: 3, kind: output, shape index: {}]  }
   0x1   :  { %10 = vsyncpa [#allocation3 + $0x1], 0 }
   0x2   :  { %11 = vsyncpa [#allocation6], 0 }
   0x3   :  { %12 = vsyncpa [#allocation4], 0 }
   0x4   :  { %14 = vsyncpa [#allocation4 + $0x1], 0  ;;  %s880_s12 = smov 0   ;;  %s882_s13 = smov 0  }
   0x5   :  { %s884_s14 = smov 0   ;;  %s886_s15 = smov 0  }
   0x6   :  { %s888_s16 = smov 0   ;;  %s890_s17 = smov 0  }
   0x7 LB: > { %s556_s18 = sadd.s32 4294967295, %s852_s17   ;;  %s557_s19 = sadd.s32 4294967294, %s852_s17   ;;  %s852_s17 = sphi %s890_s17, %s20_s17   ;;  %s848_s16 = sphi %s888_s16, %s1142_s16   ;;  %s844_s15 = sphi %s886_s15, %s1141_s15   ;;  %s840_s14 = sphi %s884_s14, %s1140_s14   ;;  %s836_s13 = sphi %s882_s13, %s1139_s13   ;;  %s832_s12 = sphi %s880_s12, %s1138_s12  }
   0x8   : > { %p54_p0 = scmp.ne.s32.totalorder %s836_s13, %s832_s12  ;;  %p916_p1 = scmp.eq.s32.totalorder %s556_s18, 0 }
   0x9   : > { %p128_p2 = scmp.eq.s32.totalorder %s557_s19, 1  ;;  %p558_p4 = scmp.ge.s32.totalorder %s852_s17, 1 }
   0xa   : > { %p922_p3 = por %p916_p1, %p54_p0  ;;  %p135_p6 = scmp.lt.s32.totalorder %s852_s17, 3 }
   0xb   : > { %p927_p5 = por %p128_p2, %p54_p0  ;;  %s146_s25 = sshll.u32 %s1128_s1, 4  ;;  %s147_s25 = int_to_ptr.hbm [resolvable:$true] %s146_s25 }
   0xc   : > { %p935_p7 = pnand %p558_p4, %p135_p6  ;;  %s854_s27 = smov [#allocation5]  }
   0xd   : > { %s148_s28 = sshll.u32 %s854_s27, 4  ;;  %p561_p10 = scmp.ge.s32.totalorder %s852_s17, 2  ;;  %s149_s28 = int_to_ptr.vmem [resolvable:$true] %s148_s28 }
   0xe   : > { %p593_p8 = pneg %p935_p7  ;;  %s160_s4 = sshll.u32 %s1129_s2, 4  ;;  %s161_s4 = int_to_ptr.hbm [resolvable:$true] %s160_s4 }
   0xf   : > { %s855_s5 = smov 256   ;;  %s856_s6 = smov 16  }
  0x10   : > { %p594_p9 = pnand %p593_p8, %p916_p1  ;;  %s857_s7 = smov [#allocation7]  }
  0x11   : > { %s162_s8 = sshll.u32 %s857_s7, 4  ;;  %p122_p11 = scmp.eq.s32.totalorder %s556_s18, 1  ;;  %s163_s8 = int_to_ptr.vmem [resolvable:$true] %s162_s8 }
  0x12   : > { %596 = dma.hbm_to_vmem [thread:$0]  (!%p594_p9), %s147_s25, 512, %s149_s28, [#allocation6], %s855_s5, %s855_s5, %s856_s6  }
  0x13   : > { %599 = dma.hbm_to_vmem [thread:$0]  (!%p594_p9), %s161_s4, 512, %s163_s8, [#allocation6], %s855_s5, %s855_s5, %s856_s6  }
  0x14   : > { %s32_s9 = sadd.s32 1, %s848_s16  ;;  %s41_s10 = sadd.s32 1, %s840_s14 }
  0x15   : > { %p34_p12 = scmp.ge.s32.totalorder %s32_s9, 2  ;;  %p48_p13 = scmp.ne.s32.totalorder %s840_s14, %s836_s13 }
  0x16   : > { %p49_p0 = scmp.eq.s32.totalorder %s852_s17, 0  ;;  %p610_p4 = scmp.lt.s32.totalorder %s852_s17, 2 }
  0x17   : > { %s1144_s9 = smov (%p34_p12, %s32_s9), 0  ;;  %p962_p2 = por %p122_p11, %p48_p13 }
  0x18   : > { %s36_s19 = ssub.s32 %s848_s16, %s1144_s9  ;;  %s176_s23 = sand.u32 1, %s840_s14  }
  0x19   : > { %p39_p6 = scmp.eq.s32.totalorder %s36_s19, 0  ;;  %p50_p8 = por %p49_p0, %p48_p13 }
  0x1a   : > { %s562_s24 = sshll.u32 %s176_s23, 6  ;;  %s578_s18 = sshll.u32 %s848_s16, 6 }
  0x1b   : > { %s972_s25 = scalar_select %p39_p6, %s840_s14, %s41_s10  }
  0x1c   : > { %s188_s29 = scalar_lea.hbm %s1127_s0, %s578_s18  ;;  %s180_s4 = scalar_lea.vmem [#allocation2], %s562_s24 }
  0x1d   : > { %s189_s30 = sshll.u32 %s188_s29, 4  ;;  %s191_s7 = sshll.u32 %s180_s4, 4  ;;  %s190_s30 = int_to_ptr.hbm [resolvable:$true] %s189_s30  ;;  %s192_s7 = int_to_ptr.vmem [resolvable:$true] %s191_s7 }
  0x1e   : > { %p601_p9 = pnand %p610_p4, %p50_p8  ;;  %s177_s8 = scalar_lea.sflag [#allocation3], %s176_s23 }
  0x1f   : > { %203 = sbr.rel (%p935_p7) target bundleno = 99 (0x63), region = 32  ;;  %s985_s10 = sand.u32 (!%p935_p7), 1, %s836_s13  }
  0x20   : > { %603 = dma.hbm_to_vmem [thread:$0]  (!%p601_p9), %s190_s30, 1024, %s192_s7, %s177_s8, %s855_s5, %s855_s5, %s856_s6  }
  0x21   : > { %s567_s19 = sshll.u32 (!%p935_p7), %s985_s10, 6  ;;  %s206_s24 = scalar_lea.sflag (!%p935_p7), [#allocation3], %s985_s10 }
  0x22   : > { %s209_s18 = scalar_lea.vmem (!%p935_p7), [#allocation2], %s567_s19 }
  0x24   : > { %819 = dma.done.wait (%p922_p3), %s206_s24, 1024  }
  0x25   : > { %821 = vsyncadd (%p922_p3), %s206_s24, 4294966272 }
  0x26   : > { %823 = dma.done.wait (%p916_p1), [#allocation6], 1024  }
  0x27   : > { %825 = vsyncadd (%p916_p1), [#allocation6], 4294966272  ;;  %v999_v0 = vld [vmem:[%s209_s18] sm:$0xff]  ;;  %v1001_v1 = vld [vmem:[%s209_s18 + $0x10] sm:$0xff]  ;;  %s580_s20 = sshll.u32 %s844_s15, 6  ;;  %s242_s21 = scalar_lea.vmem [#allocation8], %s567_s19 }
  0x28   : > { %v1003_v2 = vld [vmem:[%s209_s18 + $0x8] sm:$0xff]  ;;  %v255_v3 = vadd.f32 %v1001_v1, %v999_v0  ;;  %v283_v4 = vmul.f32 %v999_v0, %v999_v0  ;;  %v285_v5 = vmul.f32 %v1001_v1, %v1001_v1  ;;  %v1011_v6 = vld [vmem:[%s209_s18 + $0x18] sm:$0xff]  ;;  %v1015_v8 = vld [vmem:[%s209_s18 + $0x20] sm:$0xff]  ;;  %s446_s6 = scalar_lea.hbm %s1130_s3, %s580_s20  ;;  %s447_s15 = sshll.u32 %s242_s21, 4  ;;  %s448_s15 = int_to_ptr.vmem [resolvable:$true] %s447_s15 }
  0x29   : > { %v284_v7 = vmul.f32 %v1003_v2, %v1003_v2  ;;  %v1017_v9 = vld [vmem:[%s209_s18 + $0x30] sm:$0xff]  ;;  %v262_v10 = vadd.f32 %v1011_v6, %v1003_v2  ;;  %v286_v11 = vmul.f32 %v1011_v6, %v1011_v6  ;;  %v287_v13 = vmul.f32 %v1015_v8, %v1015_v8  ;;  %v1027_v14 = vld [vmem:[%s209_s18 + $0x28] sm:$0xff]  ;;  %v1029_v15 = vld [vmem:[%s209_s18 + $0x38] sm:$0xff]  ;;  %s449_s23 = sshll.u32 %s446_s6, 4  ;;  %s432_s27 = scalar_lea.sflag [#allocation4], %s985_s10  ;;  %s450_s23 = int_to_ptr.hbm [resolvable:$true] %s449_s23 }
  0x2a   : > { %v269_v12 = vadd.f32 %v1017_v9, %v1015_v8  ;;  %v256_v16 = vrot.slane %v255_v3, 4  ;;  %v291_v17 = vadd.f32 %v285_v5, %v283_v4  ;;  %v289_v18 = vmul.f32 %v1017_v9, %v1017_v9  ;;  %s780_s28 = sshra.s32 %s450_s23, 4  ;;  %s786_s7 = scalar_lea.hbm %s1130_s3, 128  ;;  %s781_s28 = int_to_ptr.hbm [resolvable:$true] %s780_s28 }
  0x2b   : > { %v276_v19 = vadd.f32 %v1029_v15, %v1027_v14  ;;  %v263_v20 = vrot.slane %v262_v10, 4  ;;  %v298_v21 = vadd.f32 %v286_v11, %v284_v7  ;;  %v288_v23 = vmul.f32 %v1027_v14, %v1027_v14  ;;  %s782_s29 = scalar_lea.hbm %s781_s28, 64  ;;  %p787_p11 = scmp.lt.s32.totalorder %s781_s28, %s1130_s3 }
  0x2c   : > { %v270_v22 = vrot.slane %v269_v12, 4  ;;  %v257_v24 = vadd.f32 %v256_v16, %v255_v3  ;;  %v292_v25 = vrot.slane %v291_v17, 4  ;;  %v305_v26 = vadd.f32 %v289_v18, %v287_v13  ;;  %p783_p1 = scmp.ne.s32.totalorder %s781_s28, %s782_s29  ;;  %p788_p12 = scmp.lt.s32.totalorder %s786_s7, %s782_s29 }
  0x2d   : > { %v277_v27 = vrot.slane %v276_v19, 4  ;;  %v264_v28 = vadd.f32 %v263_v20, %v262_v10  ;;  %v299_v29 = vrot.slane %v298_v21, 4  ;;  %v290_v31 = vmul.f32 %v1029_v15, %v1029_v15 }
  0x2e   : > { %v271_v30 = vadd.f32 %v270_v22, %v269_v12  ;;  %v258_v32 = vrot.slane %v257_v24, 2  ;;  %v293_v33 = vadd.f32 %v292_v25, %v291_v17  ;;  %v306_v34 = vrot.slane %v305_v26, 4  ;;  %p784_p3 = pnand %p783_p1, %p962_p2  ;;  %p789_p13 = por %p788_p12, %p787_p11 }
  0x2f   : > { %v278_v35 = vadd.f32 %v277_v27, %v276_v19  ;;  %v265_v36 = vrot.slane %v264_v28, 2  ;;  %v300_v37 = vadd.f32 %v299_v29, %v298_v21  ;;  %v312_v39 = vadd.f32 %v290_v31, %v288_v23 }
  0x30   : > { %v272_v38 = vrot.slane %v271_v30, 2  ;;  %v259_v40 = vadd.f32 %v258_v32, %v257_v24  ;;  %v294_v41 = vrot.slane %v293_v33, 2  ;;  %v307_v42 = vadd.f32 %v306_v34, %v305_v26  ;;  %p785_p7 = pneg %p784_p3 }
  0x31   : > { %v279_v43 = vrot.slane %v278_v35, 2  ;;  %v266_v44 = vadd.f32 %v265_v36, %v264_v28  ;;  %v301_v45 = vrot.slane %v300_v37, 2  ;;  %v313_v47 = vrot.slane %v312_v39, 4 }
  0x32   : > { %v273_v46 = vadd.f32 %v272_v38, %v271_v30  ;;  %v260_v48 = vrot.slane %v259_v40, 1  ;;  %v295_v49 = vadd.f32 %v294_v41, %v293_v33  ;;  %v308_v50 = vrot.slane %v307_v42, 2  ;;  %p790_p0 = pnand %p789_p13, %p785_p7 }
  0x33   : > { %v280_v51 = vadd.f32 %v279_v43, %v278_v35  ;;  %v267_v52 = vrot.slane %v266_v44, 1  ;;  %v302_v53 = vadd.f32 %v301_v45, %v300_v37  ;;  %v314_v55 = vadd.f32 %v313_v47, %v312_v39 }
  0x34   : > { %v274_v54 = vrot.slane %v273_v46, 1  ;;  %v261_v56 = vadd.f32 %v260_v48, %v259_v40  ;;  %v296_v57 = vrot.slane %v295_v49, 1  ;;  %v309_v58 = vadd.f32 %v308_v50, %v307_v42 }
  0x35   : > { %v281_v59 = vrot.slane %v280_v51, 1  ;;  %v268_v60 = vadd.f32 %v267_v52, %v266_v44  ;;  %v303_v61 = vrot.slane %v302_v53, 1  ;;  %v315_v63 = vrot.slane %v314_v55, 2 }
  0x36   : > { %v275_v62 = vadd.f32 %v274_v54, %v273_v46  ;;  %v297_v3 = vadd.f32 %v296_v57, %v295_v49  ;;  %v1039_v4 = vmul.f32 0.0625, %v261_v56  ;;  %v310_v5 = vrot.slane %v309_v58, 1 }
  0x37   : > { %v282_v7 = vadd.f32 %v281_v59, %v280_v51  ;;  %v304_v10 = vadd.f32 %v303_v61, %v302_v53  ;;  %v1041_v11 = vmul.f32 0.0625, %v268_v60  ;;  %v316_v13 = vadd.f32 %v315_v63, %v314_v55  ;;  %v383_v63 = vld [vmem:[#allocation5] sm:$0xff] }
  0x38   : > { %v1043_v12 = vmul.f32 0.0625, %v275_v62  ;;  %v323_v16 = vmul.f32 0.0625, %v297_v3  ;;  %v327_v17 = vmul.f32 %v1039_v4, %v1039_v4  ;;  %v311_v21 = vadd.f32 %v310_v5, %v309_v58  ;;  %v385_v3 = vld [vmem:[#allocation5 + $0x10] sm:$0xff]  ;;  %v384_v5 = vld [vmem:[#allocation5 + $0x8] sm:$0xff] }
  0x39   : > { %v324_v18 = vmul.f32 0.0625, %v304_v10  ;;  %v328_v19 = vmul.f32 %v1041_v11, %v1041_v11  ;;  %v317_v24 = vrot.slane %v316_v13, 1  ;;  %v1051_v25 = vmul.f32 0.0625, %v282_v7  ;;  %v386_v10 = vld [vmem:[#allocation5 + $0x18] sm:$0xff] }
  0x3a   : > { %v331_v20 = vsub.f32 %v323_v16, %v327_v17  ;;  %v329_v22 = vmul.f32 %v1043_v12, %v1043_v12  ;;  %v325_v27 = vmul.f32 0.0625, %v311_v21  ;;  %v391_v52 = vsub.f32 %v999_v0, %v1039_v4  ;;  %v389_v17 = vld [vmem:[#allocation7 + $0x10] sm:$0xff] }
  0x3b   : > { %v332_v23 = vsub.f32 %v324_v18, %v328_v19  ;;  %v318_v29 = vadd.f32 %v317_v24, %v316_v13  ;;  %v330_v30 = vmul.f32 %v1051_v25, %v1051_v25  ;;  %v393_v53 = vsub.f32 %v1001_v1, %v1039_v4  ;;  %v387_v13 = vld [vmem:[#allocation7] sm:$0xff]  ;;  %v390_v24 = vld [vmem:[#allocation7 + $0x18] sm:$0xff] }
  0x3c   : > { %v335_v26 = vmax.f32 %v331_v20, 0.0  ;;  %v333_v32 = vsub.f32 %v325_v27, %v329_v22  ;;  %v392_v56 = vsub.f32 %v1003_v2, %v1041_v11  ;;  %v394_v57 = vsub.f32 %v1011_v6, %v1041_v11  ;;  %v388_v22 = vld [vmem:[#allocation7 + $0x8] sm:$0xff] }
  0x3d   : > { %v336_v28 = vmax.f32 %v332_v23, 0.0  ;;  %v326_v34 = vmul.f32 0.0625, %v318_v29  ;;  %v395_v1 = vsub.f32 %v1015_v8, %v1043_v12  ;;  %v397_v20 = vsub.f32 %v1017_v9, %v1043_v12 }
  0x3e   : > { %v339_v31 = vadd.f32 1e-08, %v335_v26  ;;  %v337_v35 = vmax.f32 %v333_v32, 0.0  ;;  %v396_v27 = vsub.f32 %v1027_v14, %v1051_v25  ;;  %v398_v9 = vsub.f32 %v1029_v15, %v1051_v25 }
  0x3f   : > { %v340_v33 = vadd.f32 1e-08, %v336_v28  ;;  %v334_v36 = vsub.f32 %v326_v34, %v330_v30 }
  0x40   : > { %668 = vrsqrt.f32 %v339_v31  ;;  %v341_v37 = vadd.f32 1e-08, %v337_v35  ;;  %vm349_vm0 = vweird.f32 %v339_v31 }
  0x41   : > { %670 = vrsqrt.f32 %v340_v33  ;;  %v338_v38 = vmax.f32 %v334_v36, 0.0  ;;  %vm359_vm2 = vweird.f32 %v340_v33 }
  0x42   : > { %672 = vrsqrt.f32 %v341_v37  ;;  %vm369_vm6 = vweird.f32 %v341_v37 }
  0x43   : > { %v1055_v39 = vadd.f32 1e-08, %v338_v38 }
  0x45   : > { %674 = vrsqrt.f32 %v1055_v39  ;;  %vm379_vm8 = vweird.f32 %v1055_v39 }
  0x46   : > { %v669_v40 = vpop.eup %668 }
  0x47   : > { %v671_v41 = vpop.eup %670  ;;  %v344_v42 = vmul.f32 %v669_v40, %v339_v31  ;;  %vm350_vm1 = vweird.f32 %v669_v40 }
  0x48   : > { %v354_v43 = vmul.f32 %v671_v41, %v340_v33  ;;  %v673_v45 = vpop.eup %672  ;;  %vm360_vm3 = vweird.f32 %v671_v41  ;;  %vm351_vm4 = vmor %vm349_vm0, %vm350_vm1 }
  0x49   : > { %v345_v44 = vmul.f32 %v669_v40, %v344_v42  ;;  %v364_v48 = vmul.f32 %v673_v45, %v341_v37  ;;  %vm361_vm5 = vmor %vm359_vm2, %vm360_vm3  ;;  %vm370_vm7 = vweird.f32 %v673_v45 }
  0x4a   : > { %v355_v46 = vmul.f32 %v671_v41, %v354_v43  ;;  %vm1072_vm10 = vmor %vm369_vm6, %vm370_vm7 }
  0x4b   : > { %v346_v47 = vmul.f32 0.5, %v345_v44  ;;  %v675_v50 = vpop.eup %674  ;;  %v365_v54 = vmul.f32 %v673_v45, %v364_v48 }
  0x4c   : > { %v356_v49 = vmul.f32 0.5, %v355_v46  ;;  %v374_v58 = vmul.f32 %v675_v50, %v1055_v39  ;;  %vm380_vm9 = vweird.f32 %v675_v50 }
  0x4d   : > { %v347_v51 = vsub.f32 1.5, %v346_v47  ;;  %v366_v60 = vmul.f32 0.5, %v365_v54  ;;  %vm381_vm11 = vmor %vm379_vm8, %vm380_vm9 }
  0x4e   : > { %v357_v55 = vsub.f32 1.5, %v356_v49  ;;  %v375_v61 = vmul.f32 %v675_v50, %v374_v58 }
  0x4f   : > { %v348_v59 = vmul.f32 %v669_v40, %v347_v51  ;;  %v367_v4 = vsub.f32 1.5, %v366_v60 }
  0x50   : > { %v358_v0 = vmul.f32 %v671_v41, %v357_v55  ;;  %v376_v8 = vmul.f32 0.5, %v375_v61 }
  0x51   : > { %v352_v62 = vsel %vm351_vm4, %v669_v40, %v348_v59  ;;  %v368_v19 = vmul.f32 %v673_v45, %v367_v4 }
  0x52   : > { %v399_v2 = vmul.f32 %v391_v52, %v352_v62  ;;  %v362_v6 = vsel %vm361_vm5, %v671_v41, %v358_v0  ;;  %v401_v7 = vmul.f32 %v393_v53, %v352_v62  ;;  %v377_v26 = vsub.f32 1.5, %v376_v8 }
  0x53   : > { %v400_v16 = vmul.f32 %v392_v56, %v362_v6  ;;  %v402_v18 = vmul.f32 %v394_v57, %v362_v6  ;;  %v372_v30 = vsel %vm1072_vm10, %v673_v45, %v368_v19 }
  0x54   : > { %v407_v21 = vmul.f32 %v399_v2, %v383_v63  ;;  %v409_v23 = vmul.f32 %v401_v7, %v385_v3  ;;  %v403_v32 = vmul.f32 %v395_v1, %v372_v30  ;;  %v378_v33 = vmul.f32 %v675_v50, %v377_v26 }
  0x55   : > { %v408_v28 = vmul.f32 %v400_v16, %v384_v5  ;;  %v410_v29 = vmul.f32 %v402_v18, %v386_v10  ;;  %v405_v14 = vmul.f32 %v397_v20, %v372_v30 }
  0x56   : > { %v415_v12 = vadd.f32 %v407_v21, %v387_v13  ;;  %v417_v31 = vadd.f32 %v409_v23, %v389_v17  ;;  %v411_v36 = vmul.f32 %v403_v32, %v383_v63  ;;  %v382_v37 = vsel %vm381_vm11, %v675_v50, %v378_v33 }
  0x57   : > { %v416_v34 = vadd.f32 %v408_v28, %v388_v22  ;;  %v418_v35 = vadd.f32 %v410_v29, %v390_v24  ;;  %v404_v38 = vmul.f32 %v396_v27, %v382_v37  ;;  %v413_v15 = vmul.f32 %v405_v14, %v385_v3 }
  0x58   : > { %423 = vst [vmem:[%s242_s21] sm:$0xff] %v415_v12  ;;  %v406_v25 = vmul.f32 %v398_v9, %v382_v37  ;;  %v419_v39 = vadd.f32 %v411_v36, %v387_v13 }
  0x59   : > { %424 = vst [vmem:[%s242_s21 + $0x8] sm:$0xff] %v416_v34  ;;  %v412_v40 = vmul.f32 %v404_v38, %v384_v5  ;;  %v421_v41 = vadd.f32 %v413_v15, %v389_v17 }
  0x5a   : > { %425 = vst [vmem:[%s242_s21 + $0x10] sm:$0xff] %v417_v31  ;;  %v414_v42 = vmul.f32 %v406_v25, %v386_v10 }
  0x5b   : > { %426 = vst [vmem:[%s242_s21 + $0x18] sm:$0xff] %v418_v35  ;;  %v420_v43 = vadd.f32 %v412_v40, %v388_v22 }
  0x5c   : > { %427 = vst [vmem:[%s242_s21 + $0x20] sm:$0xff] %v419_v39  ;;  %v422_v44 = vadd.f32 %v414_v42, %v390_v24 }
  0x5d   : > { %429 = vst [vmem:[%s242_s21 + $0x30] sm:$0xff] %v421_v41 }
  0x5e   : > { %428 = vst [vmem:[%s242_s21 + $0x28] sm:$0xff] %v420_v43 }
  0x5f   : > { %430 = vst [vmem:[%s242_s21 + $0x38] sm:$0xff] %v422_v44 }
  0x60   : > { %793 = shalt.err (!%p790_p0)
}
  0x61   : > { %s858_s10 = smov 256   ;;  %s859_s24 = smov 16  }
  0x62   : > { %591 = dma.vmem_to_hbm [thread:$0]  (%p962_p2), %s448_s15, 1024, %s450_s23, %s432_s27, %s858_s10, %s858_s10, %s859_s24  }
  0x63 PF: > { %s464_s18 = sand.u32 1, %s832_s12   ;;  %p605_p4 = pnand %p561_p10, %p927_p5 }
  0x64   : > { %s465_s20 = scalar_lea.sflag [#allocation4], %s464_s18 }
  0x65   : > { %p606_p6 = pneg %p605_p4 }
  0x67   : > { %827 = dma.done.wait (%p606_p6), %s465_s20, 1024  }
  0x68   : > { %829 = vsyncadd (%p606_p6), %s465_s20, 4294966272  ;;  %s20_s17 = sadd.s32 1, %s852_s17   ;;  %s1138_s12 = smov %s836_s13 }
  0x69   : > { %p17_p8 = scmp.ge.s32.totalorder %s20_s17, 4   ;;  %s1139_s13 = smov %s840_s14 }
  0x6a   : > { %s1140_s14 = smov %s972_s25  ;;  %s1141_s15 = smov %s848_s16 }
  0x6b   : > { %s1142_s16 = smov %s1144_s9  ;;  %19 = sbr.rel (!%p17_p8) target bundleno = 7 (0x7), region = 85 }
  0x70   :  { %471 = vsyncpa [#allocation3], 1 }
  0x71   :  { %473 = vsyncpa [#allocation3 + $0x1], 1 }
  0x72   :  { %474 = vsyncpa [#allocation6], 1 }
  0x73   :  { %475 = vsyncpa [#allocation4], 1 }
  0x74   :  { %477 = vsyncpa [#allocation4 + $0x1], 1 }

</bundles_post_ra>
